<compile_context>
chip_gen: v7x
topology: tpu7x:2x2x1
jax: 0.10.0
libtpu: 0.0.40
codegen_flags: <defaults>
</compile_context>

<pallas_src>
import functools

import jax
import jax.numpy as jnp
from jax.experimental import pallas as pl
from jax.experimental.pallas import tpu as pltpu


def _center_loss_kernel(x_ref, c_ref, out_ref, *, block_rows, batch_size,
                        tiles_per_split):
    """Accumulate sum_i clamp(||x_i - c_{labels_i}||^2, 1e-12, 1e12) per split.

    x_ref / c_ref: (block_rows, D) tiles of the features and the pre-gathered
        per-row centers (centers[labels]).
    out_ref: (1, 1) f32 SMEM block; constant block index along the tile axis,
        so it is the resident per-split accumulator.
    """
    split = pl.program_id(0)
    tile = pl.program_id(1)

    @pl.when(tile == 0)
    def _init():
        out_ref[0, 0] = jnp.float32(0.0)

    x = x_ref[...].astype(jnp.float32)                       # (TM, D) VPU
    c = c_ref[...].astype(jnp.float32)
    diff = x - c
    # Per-row squared distance: one cross-lane reduce per tile, amortized over
    # TM*D elements; steady state is pure VPU sub/mul.
    d = jnp.sum(diff * diff, axis=-1, keepdims=True)         # (TM, 1)
    d = jnp.clip(d, 1e-12, 1e12)                             # torch clamp

    # Mask rows past the end of the batch: the ragged last tile and any surplus
    # tile handed to a split (its block index was clamped in the index_map so
    # the DMA stays in bounds; its rows are zeroed here).
    row0 = (split * tiles_per_split + tile) * block_rows
    rows = row0 + jax.lax.broadcasted_iota(jnp.int32, (block_rows, 1), 0)
    d = jnp.where(rows < batch_size, d, 0.0)

    out_ref[0, 0] += jnp.sum(d)


def _pick_block_rows(batch, feat_dim, itemsize, *, max_block_rows=512):
    # 2 streamed inputs x 2 pipeline buffers per tile; stay well inside the
    # smallest scoped-VMEM default (v5e 16 MiB; v6e/v7x 32 MiB scoped).
    budget_bytes = 12 * 1024 * 1024
    cap = budget_bytes // max(1, 4 * feat_dim * itemsize)
    cap = max(32, (cap // 32) * 32)     # multiple of 32: legal f32/bf16/int8 tile
    tm = min(max_block_rows, cap)
    if batch <= tm:
        return batch                    # block == full dim -> always a legal shape
    return tm


def center_loss(x, centers, labels, *, max_block_rows=512, num_splits=2):
    """x: (B, D), centers: (C, D), labels: (B,) int -> scalar f32 loss."""
    B, D = x.shape
    C, Dc = centers.shape
    assert D == Dc, "feat_dim mismatch between features and centers"

    # Pre-gather centers[labels] -> (B, D): moves the data-dependent gather out
    # of the BlockSpec so the kernel can stream large contiguous (TM, D) tiles.
    # TODO(synk): for very large B an in-kernel manual-DMA gather (centers kept
    # in pl.ANY + per-row make_async_copy double buffer) would avoid
    # materializing this intermediate; total HBM center reads are identical.
    gathered = jnp.take(centers, labels.astype(jnp.int32), axis=0)

    tm = _pick_block_rows(B, D, jnp.dtype(x.dtype).itemsize,
                          max_block_rows=max_block_rows)
    num_blocks = pl.cdiv(B, tm)
    splits = num_splits if num_blocks >= num_splits else 1
    tiles_per_split = pl.cdiv(num_blocks, splits)

    def row_block(split, tile):
        # Clamp so surplus tiles on the last split keep their DMA in bounds;
        # those rows are masked to zero inside the kernel.
        return (jnp.minimum(split * tiles_per_split + tile, num_blocks - 1), 0)

    kernel = functools.partial(
        _center_loss_kernel, block_rows=tm, batch_size=B,
        tiles_per_split=tiles_per_split)

    partials = pl.pallas_call(
        kernel,
        out_shape=jax.ShapeDtypeStruct((splits, 1), jnp.float32),
        grid_spec=pltpu.PrefetchScalarGridSpec(
            num_scalar_prefetch=0,
            grid=(splits, tiles_per_split),
            in_specs=[
                pl.BlockSpec((tm, D), row_block),   # features tile
                pl.BlockSpec((tm, D), row_block),   # gathered-centers tile
            ],
            out_specs=pl.BlockSpec((1, 1), lambda s, t: (s, 0),
                                   memory_space=pltpu.MemorySpace.SMEM),
        ),
        compiler_params=pltpu.CompilerParams(
            # Outer split axis is independent (megacore-shardable on v7x);
            # the tile axis is a reduction into the resident SMEM accumulator.
            dimension_semantics=("parallel", "arbitrary"),
        ),
    )(x, gathered)

    # Each of the (B*C - B) masked-out zeros of the reference (B, C) matrix is
    # clamped to 1e-12; add that contribution analytically.
    masked_term = jnp.float32((C - 1) * 1e-12)
    return jnp.sum(partials) / jnp.float32(B) + masked_term


if __name__ == "__main__":
    # Small deterministic problem consistent with CenterLoss(num_classes, feat_dim).
    batch_size = 36          # deliberately not a multiple of 8 to hit masking
    feat_dim = 128
    num_classes = 16

    key = jax.random.PRNGKey(0)
    kx, kc, kl = jax.random.split(key, 3)

    x = jax.random.normal(kx, (batch_size, feat_dim), dtype=jnp.float32)
    # Deterministic stand-in for the nn.Parameter centers (torch.randn).
    centers = jax.random.normal(kc, (num_classes, feat_dim), dtype=jnp.float32)
    labels = jax.random.randint(kl, (batch_size,), 0, num_classes,
                                dtype=jnp.int32)

    # Pure-JAX reference with the same math as the PyTorch forward.
    x2 = jnp.sum(x ** 2, axis=1, keepdims=True)
    c2 = jnp.sum(centers ** 2, axis=1, keepdims=True)
    xc = jnp.dot(x, centers.T, precision=jax.lax.Precision.HIGHEST)
    distmat = x2 + c2.T - 2.0 * xc
    mask = (labels[:, None] == jnp.arange(num_classes)[None, :]).astype(jnp.float32)
    ref = jnp.sum(jnp.clip(distmat * mask, 1e-12, 1e12)) / batch_size

    # 1) Default tiling (single tile at this small B).
    loss = center_loss(x, centers, labels)
    jax.block_until_ready(loss)
    assert jnp.allclose(loss, ref, rtol=1e-5, atol=1e-4), (loss, ref)

    # 2) Force multi-tile / multi-split path (ragged last tile + surplus tile)
    #    to exercise the masking and the clamped index_map.
    loss_tiled = center_loss(x, centers, labels, max_block_rows=8)
    jax.block_until_ready(loss_tiled)
    assert jnp.allclose(loss_tiled, ref, rtol=1e-5, atol=1e-4), (loss_tiled, ref)

    print("KERNEL_OK")
</pallas_src>

<mosaic_0001>
module attributes {stable_mosaic.version = 11 : i64} {
  func.func @_center_loss_kernel(%arg0: i32, %arg1: i32, %arg2: memref<36x128xf32, #tpu.memory_space<vmem>>, %arg3: memref<36x128xf32, #tpu.memory_space<vmem>>, %arg4: memref<1x1xf32, #tpu.memory_space<smem>>) attributes {dimension_semantics = [#tpu.dimension_semantics<parallel>, #tpu.dimension_semantics<arbitrary>], iteration_bounds = array<i64: 1, 1>, scalar_prefetch = 0 : i64, scratch_operands = 0 : i64, tpu.core_type = #tpu.core_type<tc>, window_params = [{transform_indices = @transform_0, window_bounds = array<i64: 36, 128>}, {transform_indices = @transform_1, window_bounds = array<i64: 36, 128>}, {transform_indices = @transform_2, window_bounds = array<i64: 1, 1>}]} {
    %c0_i32 = arith.constant 0 : i32
    %0 = arith.cmpi eq, %arg1, %c0_i32 : i32
    %1 = arith.extui %0 : i1 to i32
    %c0_i32_0 = arith.constant 0 : i32
    %2 = arith.cmpi ne, %1, %c0_i32_0 : i32
    scf.if %2 {
      %cst_13 = arith.constant 0.000000e+00 : f32
      %c0_14 = arith.constant 0 : index
      %c0_15 = arith.constant 0 : index
      %30 = memref.load %arg4[%c0_14, %c0_15] : memref<1x1xf32, #tpu.memory_space<smem>>
      memref.store %cst_13, %arg4[%c0_14, %c0_15] : memref<1x1xf32, #tpu.memory_space<smem>>
    } else {
    }
    %c0 = arith.constant 0 : index
    %c0_1 = arith.constant 0 : index
    %3 = vector.load %arg2[%c0, %c0_1] : memref<36x128xf32, #tpu.memory_space<vmem>>, vector<36x128xf32>
    %c0_2 = arith.constant 0 : index
    %c0_3 = arith.constant 0 : index
    %4 = vector.load %arg3[%c0_2, %c0_3] : memref<36x128xf32, #tpu.memory_space<vmem>>, vector<36x128xf32>
    %5 = arith.subf %3, %4 : vector<36x128xf32>
    %6 = arith.mulf %5, %5 : vector<36x128xf32>
    %cst = arith.constant dense<0.000000e+00> : vector<36xf32>
    %7 = vector.multi_reduction <add>, %6, %cst [1] : vector<36x128xf32> to vector<36xf32>
    %8 = vector.shape_cast %7 : vector<36xf32> to vector<36x1xf32>
    %cst_4 = arith.constant 9.99999996E-13 : f32
    %cst_5 = arith.constant 9.99999995E+11 : f32
    %9 = vector.broadcast %cst_4 : f32 to vector<36x1xf32>
    %10 = arith.maximumf %9, %8 : vector<36x1xf32>
    %11 = vector.broadcast %cst_5 : f32 to vector<36x1xf32>
    %12 = arith.minimumf %11, %10 : vector<36x1xf32>
    %c1_i32 = arith.constant 1 : i32
    %13 = arith.muli %arg0, %c1_i32 : i32
    %14 = arith.addi %13, %arg1 : i32
    %c36_i32 = arith.constant 36 : i32
    %15 = arith.muli %14, %c36_i32 : i32
    %16 = tpu.iota {dimensions = array<i32: 0>} : vector<36x1xi32>
    %17 = vector.broadcast %15 : i32 to vector<36x1xi32>
    %18 = arith.addi %17, %16 : vector<36x1xi32>
    %c36_i32_6 = arith.constant 36 : i32
    %19 = vector.broadcast %c36_i32_6 : i32 to vector<36x1xi32>
    %20 = arith.cmpi slt, %18, %19 : vector<36x1xi32>
    %cst_7 = arith.constant 0.000000e+00 : f32
    %21 = vector.broadcast %cst_7 : f32 to vector<36x1xf32>
    %22 = arith.select %20, %12, %21 : vector<36x1xi1>, vector<36x1xf32>
    %c0_8 = arith.constant 0 : index
    %c0_9 = arith.constant 0 : index
    %23 = memref.load %arg4[%c0_8, %c0_9] : memref<1x1xf32, #tpu.memory_space<smem>>
    %24 = vector.shape_cast %22 : vector<36x1xf32> to vector<1x36x1xf32>
    %cst_10 = arith.constant dense<0.000000e+00> : vector<1xf32>
    %25 = vector.multi_reduction <add>, %24, %cst_10 [1, 2] : vector<1x36x1xf32> to vector<1xf32>
    %26 = vector.shape_cast %25 : vector<1xf32> to vector<1x1x1xf32>
    %27 = vector.extract %26[0, 0, 0] : f32 from vector<1x1x1xf32>
    %28 = arith.addf %23, %27 : f32
    %c0_11 = arith.constant 0 : index
    %c0_12 = arith.constant 0 : index
    %29 = memref.load %arg4[%c0_11, %c0_12] : memref<1x1xf32, #tpu.memory_space<smem>>
    memref.store %28, %arg4[%c0_11, %c0_12] : memref<1x1xf32, #tpu.memory_space<smem>>
    return
  }
  func.func @transform_0(%arg0: i32, %arg1: i32) -> (i32, i32) {
    %c1_i32 = arith.constant 1 : i32
    %0 = arith.muli %arg0, %c1_i32 : i32
    %1 = arith.addi %0, %arg1 : i32
    %c0_i32 = arith.constant 0 : i32
    %2 = arith.minsi %1, %c0_i32 : i32
    %c0_i32_0 = arith.constant 0 : i32
    %c0_i32_1 = arith.constant 0 : i32
    return %2, %c0_i32_0 : i32, i32
  }
  func.func @transform_1(%arg0: i32, %arg1: i32) -> (i32, i32) {
    %c1_i32 = arith.constant 1 : i32
    %0 = arith.muli %arg0, %c1_i32 : i32
    %1 = arith.addi %0, %arg1 : i32
    %c0_i32 = arith.constant 0 : i32
    %2 = arith.minsi %1, %c0_i32 : i32
    %c0_i32_0 = arith.constant 0 : i32
    %c0_i32_1 = arith.constant 0 : i32
    return %2, %c0_i32_0 : i32, i32
  }
  func.func @transform_2(%arg0: i32, %arg1: i32) -> (i32, i32) {
    %c0_i32 = arith.constant 0 : i32
    %c0_i32_0 = arith.constant 0 : i32
    return %arg0, %c0_i32 : i32, i32
  }
}

</mosaic_0001>

<bundles_post_ra>
// kernel: tpu_custom_call.1
= control target key start
LH: loop header
LB: loop body
LE: loop exit
PB: predicated region body
PF: predicated region fallthrough
CT: control target
= control target key end

     0   :  { %7 = vsyncpa [#allocation3], 0  ;;  %s299_s0 = inlined_call_operand.hbm [shape: f32[36,128], index: 0, kind: input, shape index: {}]   ;;  %s300_s1 = inlined_call_operand.hbm [shape: f32[36,128], index: 1, kind: input, shape index: {}]   ;;  %s301_s2 = inlined_call_operand.hbm [shape: f32[1,1], index: 2, kind: output, shape index: {}]  }
   0x1   :  { %8 = vsyncpa [#allocation6], 0 }
   0x2   :  { %9 = vsyncpa [#allocation4], 0  ;;  %s243_s9 = smov [#allocation2]   ;;  %s183_s13 = scalar_lea.hbm %s299_s0, 640 }
   0x3   :  { %s21_s10 = sshll.u32 %s243_s9, 4  ;;  %p184_p0 = scmp.ne.s32.totalorder %s299_s0, %s183_s13  ;;  %s22_s10 = int_to_ptr.vmem [resolvable:$true] %s21_s10 }
   0x4   :  { %p187_p1 = scmp.lt.u32.totalorder %s183_s13, %s299_s0 }
   0x6   :  { %p189_p2 = pnand %p187_p1, %p184_p0 }
   0x8   :  { %192 = shalt.err (!%p189_p2)
}
   0x9   :  { %s193_s18 = scalar_lea.vmem %s22_s10, 640  ;;  %p198_p4 = scmp.lt.s32.totalorder %s22_s10, %s22_s10 }
   0xa   :  { %p194_p3 = scmp.ne.s32.totalorder %s22_s10, %s193_s18  ;;  %p199_p5 = scmp.lt.s32.totalorder %s193_s18, %s193_s18 }
   0xc   :  { %p200_p6 = por %p199_p5, %p198_p4 }
   0xe   :  { %p201_p7 = pnand %p200_p6, %p194_p3 }
  0x10   :  { %204 = shalt.err (!%p201_p7)
}
  0x11   :  { %s244_s19 = smov 128   ;;  %s245_s20 = smov 8  }
  0x12   :  { %27 = dma.hbm_to_vmem [thread:$0]  %s299_s0, 640, %s22_s10, [#allocation3], %s244_s19, %s244_s19, %s245_s20  }
  0x13   :  { %s246_s23 = smov [#allocation5]   ;;  %s205_s27 = scalar_lea.hbm %s300_s1, 640 }
  0x14   :  { %s39_s24 = sshll.u32 %s246_s23, 4  ;;  %p206_p8 = scmp.ne.s32.totalorder %s300_s1, %s205_s27  ;;  %s40_s24 = int_to_ptr.vmem [resolvable:$true] %s39_s24 }
  0x15   :  { %p209_p9 = scmp.lt.u32.totalorder %s205_s27, %s300_s1 }
  0x17   :  { %p211_p10 = pnand %p209_p9, %p206_p8 }
  0x19   :  { %214 = shalt.err (!%p211_p10)
}
  0x1a   :  { %s215_s4 = scalar_lea.vmem %s40_s24, 640  ;;  %p220_p12 = scmp.lt.s32.totalorder %s40_s24, %s40_s24 }
  0x1b   :  { %p216_p11 = scmp.ne.s32.totalorder %s40_s24, %s215_s4  ;;  %p221_p13 = scmp.lt.s32.totalorder %s215_s4, %s215_s4 }
  0x1d   :  { %p222_p0 = por %p221_p13, %p220_p12 }
  0x1f   :  { %p223_p1 = pnand %p222_p0, %p216_p11 }
  0x21   :  { %226 = shalt.err (!%p223_p1)
}
  0x22   :  { %45 = dma.hbm_to_vmem [thread:$0]  %s300_s1, 640, %s40_s24, [#allocation6], %s244_s19, %s244_s19, %s245_s20  }
  0x23   :  { %237 = dma.done.wait [#allocation3], 640  }
  0x24   :  { %238 = vsyncadd [#allocation3], 4294966656 }
  0x25   :  { %239 = dma.done.wait [#allocation6], 640  }
  0x26   :  { %240 = vsyncadd [#allocation6], 4294966656  ;;  %v66_v0 = vld [vmem:[#allocation2] sm:$0xff]  ;;  %v71_v1 = vld [vmem:[#allocation5] sm:$0xff]  ;;  %vm94_vm0 = vcmask 1043456   ;;  %v110_v21 = vlaneseq  ;;  %vm133_vm1 = vcmask 7168  }
  0x27   :  { %v68_v2 = vld [vmem:[#allocation2 + $0x10] sm:$0xff]  ;;  %v76_v3 = vsub.f32 %v66_v0, %v71_v1  ;;  %v73_v4 = vld [vmem:[#allocation5 + $0x10] sm:$0xff]  ;;  %v67_v5 = vld [vmem:[#allocation2 + $0x8] sm:$0xff]  ;;  %vm141_vm3 = vcmask 3072   ;;  %s227_s8 = scalar_lea.hbm %s301_s2, 16 }
  0x28   :  { %v72_v6 = vld [vmem:[#allocation5 + $0x8] sm:$0xff]  ;;  %v78_v7 = vsub.f32 %v68_v2, %v73_v4  ;;  %v69_v9 = vld [vmem:[#allocation2 + $0x18] sm:$0xff]  ;;  %v74_v10 = vld [vmem:[#allocation5 + $0x18] sm:$0xff]  ;;  %v111_v25 = vshrl.u32 %v110_v21, 7  ;;  %p228_p2 = scmp.ne.s32.totalorder %s301_s2, %s227_s8  ;;  %p231_p3 = scmp.lt.u32.totalorder %s227_s8, %s301_s2 }
  0x29   :  { %v77_v8 = vsub.f32 %v67_v5, %v72_v6  ;;  %v70_v11 = vld [vmem:[#allocation2 + $0x20] sm:$0xf]  ;;  %v81_v12 = vmul.f32 %v76_v3, %v76_v3  ;;  %v79_v13 = vsub.f32 %v69_v9, %v74_v10  ;;  %v75_v14 = vld [vmem:[#allocation5 + $0x20] sm:$0xf] }
  0x2a   :  { %v83_v15 = vmul.f32 %v78_v7, %v78_v7  ;;  %v80_v16 = vsub.f32 %v70_v11, %v75_v14  ;;  %v115_v32 = vadd.s32 32, %v111_v25  ;;  %p233_p4 = pnand %p231_p3, %p228_p2 }
  0x2b   :  { %86 = vadd.xlane.f32.xlu0 %v81_v12  ;;  %v82_v17 = vmul.f32 %v77_v8, %v77_v8  ;;  %v84_v18 = vmul.f32 %v79_v13, %v79_v13 }
  0x2c   :  { %90 = vadd.xlane.f32.xlu1 %v83_v15  ;;  %v85_v19 = vmul.f32 %v80_v16, %v80_v16  ;;  %vm126_vm2 = vcmp.lt.s32.totalorder %v115_v32, 36 }
  0x2e   :  { %v95_v20 = vsel %vm94_vm0, %v85_v19, 0.0 }
  0x2f   :  { %88 = vadd.xlane.f32.xlu0 %v82_v17 }
  0x30   :  { %92 = vadd.xlane.f32.xlu1 %v84_v18 }
  0x33   :  { %96 = vadd.xlane.f32.xlu0 %v95_v20 }
  0xb8   :  { %v87_v22 = vpop.xlane.xlu0 %86 }
  0xb9   :  { %v98_v23 = vmax.f32 %v87_v22, 1e-12  ;;  %v91_v24 = vpop.xlane.xlu1 %90 }
  0xba   :  { %v100_v26 = vmax.f32 %v91_v24, 1e-12 }
  0xbb   :  { %v103_v28 = vmin.f32 %v98_v23, 1e+12 }
  0xbc   :  { %v89_v27 = vpop.xlane.xlu0 %88  ;;  %v105_v33 = vmin.f32 %v100_v26, 1e+12 }
  0xbd   :  { %v99_v29 = vmax.f32 %v89_v27, 1e-12  ;;  %v93_v30 = vpop.xlane.xlu1 %92  ;;  %v134_v37 = vsel %vm133_vm1, %v103_v28, 0.0 }
  0xbe   :  { %v101_v31 = vmax.f32 %v93_v30, 1e-12  ;;  %v137_v41 = vsel %vm133_vm1, %v105_v33, 0.0 }
  0xbf   :  { %v104_v34 = vmin.f32 %v99_v29, 1e+12 }
  0xc0   :  { %v106_v35 = vmin.f32 %v101_v31, 1e+12  ;;  %v97_v36 = vpop.xlane.xlu0 %96 }
  0xc1   :  { %v135_v38 = vsel %vm133_vm1, %v104_v34, 0.0  ;;  %v102_v39 = vmax.f32 %v97_v36, 1e-12 }
  0xc2   :  { %v136_v40 = vadd.f32 %v135_v38, %v134_v37  ;;  %v139_v42 = vsel %vm133_vm1, %v106_v35, 0.0 }
  0xc3   :  { %v107_v43 = vmin.f32 %v102_v39, 1e+12 }
  0xc4   :  { %v138_v44 = vadd.f32 %v137_v41, %v136_v40 }
  0xc5   :  { %v131_v45 = vsel %vm126_vm2, %v107_v43, 0.0 }
  0xc6   :  { %v140_v46 = vadd.f32 %v139_v42, %v138_v44  ;;  %v142_v47 = vsel %vm141_vm3, %v131_v45, 0.0 }
  0xc8   :  { %v143_v48 = vadd.f32 %v142_v47, %v140_v46 }
  0xca   :  { %144 = vadd.xlane.f32.xlu1 %v143_v48 }
 0x157   :  { %v145_v49 = vpop.xlane.xlu1 %144 }
 0x158   :  { %v146_v50 = vrot.slane %v145_v49, 4 }
 0x15a   :  { %v147_v51 = vadd.f32 %v146_v50, %v145_v49 }
 0x15c   :  { %v148_v52 = vrot.slane %v147_v51, 2 }
 0x15e   :  { %v149_v53 = vadd.f32 %v148_v52, %v147_v51 }
 0x160   :  { %v150_v54 = vrot.slane %v149_v53, 1 }
 0x162   :  { %v151_v55 = vadd.f32 %v150_v54, %v149_v53 }
 0x164   :  { %175 = vpush %v151_v55 }
 0x195   :  { %s176_s1 = spop %175 }
 0x196   :  { %155 = sst [smem:[#allocation7]] %s176_s1 }
 0x197   :  { %236 = shalt.err (!%p233_p4)
}
 0x198   :  { %s247_s13 = smov [#allocation7]  }
 0x199   :  { %163 = dma.smem_to_hbm %s247_s13, 16, %s301_s2, [#allocation4]  }
 0x19a   :  { %241 = dma.done.wait [#allocation4], 16  }
 0x19b   :  { %242 = vsyncadd [#allocation4], 4294967280 }
 0x19c   :  { %167 = sfence }
 0x19d   :  { %168 = vsyncpa [#allocation3], 1 }
 0x19e   :  { %169 = vsyncpa [#allocation6], 1 }
 0x19f   :  { %170 = vsyncpa [#allocation4], 1 }

</bundles_post_ra>
